<compile_context>
chip_gen: v6e
topology: v6e:2x2x1
jax: 0.10.0
libtpu: 0.0.40
codegen_flags: <defaults>
</compile_context>

<pallas_src>
import functools
import math

import jax
import jax.numpy as jnp
from jax.experimental import pallas as pl
from jax.experimental.pallas import tpu as pltpu

LOG_STD_MAX = 2.0
LOG_STD_MIN = -5.0
OUT_PAD = 128            # lane-dense output slab width
_MEGACORE_MIN_B = 256    # split batch into >=2 grid steps above this (v7x megacore)


def _round_up(x, m):
    return (x + m - 1) // m * m


def actor_kernel(obs_ref, eps_ref, w1_ref, w2_ref, wh_ref, vecs_ref, out_ref,
                 *, h1, h2, act_dim, head_pad):
    x = obs_ref[...].astype(jnp.float32)       # accepts f32 or bf16 inputs
    eps = eps_ref[...].astype(jnp.float32)

    # Packed small vectors: one lane-dense (8, padw) block -> a single DMA.
    b1 = vecs_ref[0:1, :h1]
    b2 = vecs_ref[1:2, :h2]
    bh = vecs_ref[2:3, :2 * head_pad]
    scale = vecs_ref[3:4, :act_dim]
    abias = vecs_ref[4:5, :act_dim]

    # MLP trunk: Linear -> ReLU -> Linear -> ReLU (output_activation == activation).
    # TODO(synk): for hidden sizes >= 256, cast MXU operands to bf16 (keep f32 accum/epilogue).
    h = jnp.dot(x, w1_ref[...], preferred_element_type=jnp.float32) + b1
    h = jnp.maximum(h, 0.0)
    h = jnp.dot(h, w2_ref[...], preferred_element_type=jnp.float32) + b2
    h = jnp.maximum(h, 0.0)

    # Fused [mu | log_std] head; each half zero-padded to a 128-lane boundary so
    # both slices below are lane-tile aligned (no XLU lane rotates).
    head = jnp.dot(h, wh_ref[...], preferred_element_type=jnp.float32) + bh
    mu = head[:, :head_pad]
    log_std = jnp.tanh(head[:, head_pad:])
    log_std = LOG_STD_MIN + 0.5 * (LOG_STD_MAX - LOG_STD_MIN) * (log_std + 1.0)
    std = jnp.exp(log_std)

    # eps-dependent epilogue: prefix (offset-0) slices only -> no relayouts.
    x_t = mu[:, :act_dim] + std[:, :act_dim] * eps      # rsample with external noise
    y_t = jnp.tanh(x_t)
    pi = y_t * scale + abias

    # Normal(mu, std).log_prob(x_t), using (x_t - mu)/std == eps exactly.
    logp = -0.5 * jnp.square(eps) - log_std[:, :act_dim] - 0.5 * math.log(2.0 * math.pi)
    logp = logp - jnp.log(scale * (1.0 - jnp.square(y_t)) + 1e-6)
    logp_sum = jnp.sum(logp, axis=1, keepdims=True)     # (tb, 1)

    # Lane-dense output slab: logp in lane `act_dim` via a single iota mask
    # (full-width unmasked vst), pi in lanes [0, act_dim) via a prefix store.
    lane = jax.lax.broadcasted_iota(jnp.int32, out_ref.shape, 1)
    out_ref[...] = jnp.where(lane == act_dim, logp_sum, 0.0).astype(out_ref.dtype)
    out_ref[:, :act_dim] = pi.astype(out_ref.dtype)


def pack_actor_params(params, act_scale, act_bias):
    """Fuse / lane-pad the actor parameters ONCE (call at parameter-update time)."""
    w1, b1, w2, b2, wmu, bmu, wls, bls = params
    obs_dim, h1 = w1.shape
    h2 = w2.shape[1]
    act_dim = wmu.shape[1]
    head_pad = _round_up(act_dim, 128)

    def _pad_cols(a, width):
        a = a.reshape(1, -1) if a.ndim == 1 else a
        a = a.astype(jnp.float32)
        return jnp.pad(a, ((0, 0), (0, width - a.shape[1])))

    # Fused [mu | log_std] head, each half zero-padded to a 128-lane boundary.
    wh = jnp.concatenate([_pad_cols(wmu, head_pad), _pad_cols(wls, head_pad)], axis=1)
    bh = jnp.concatenate([_pad_cols(bmu.reshape(1, -1), head_pad),
                          _pad_cols(bls.reshape(1, -1), head_pad)], axis=1)

    # All small (1, dim) vectors packed into ONE lane-dense (8, padw) block.
    padw = max(_round_up(max(h1, h2), 128), 2 * head_pad)
    rows = [b1, b2, bh, act_scale, act_bias]
    vecs = jnp.concatenate(
        [_pad_cols(r.reshape(1, -1), padw) for r in rows]
        + [jnp.zeros((8 - len(rows), padw), jnp.float32)], axis=0)

    return dict(w1=w1.astype(jnp.float32), w2=w2.astype(jnp.float32),
                wh=wh, vecs=vecs, obs_dim=obs_dim, h1=h1, h2=h2,
                act_dim=act_dim, head_pad=head_pad)


def _pick_tile(B, batch_tile):
    """Return (tile_rows, grid, use_full_blocks)."""
    if B <= batch_tile and B <= _MEGACORE_MIN_B:
        return B, 1, True                              # one block == exact array shapes
    tb = min(_round_up(batch_tile, 16), _round_up(B, 16))
    if pl.cdiv(B, tb) < 2:                             # large batch -> >=2 steps for megacore
        tb = _round_up(pl.cdiv(B, 2), 16)
    return tb, pl.cdiv(B, tb), False


def squashed_gaussian_actor(obs, eps, packed, *, batch_tile=2048,
                            out_dtype=jnp.bfloat16):
    """pi_action, logp_pi for the stochastic (deterministic=False, with_log_prob=True) path."""
    B, obs_dim = obs.shape
    act_dim = packed["act_dim"]
    w1, w2, wh, vecs = packed["w1"], packed["w2"], packed["wh"], packed["vecs"]

    tb, grid, full = _pick_tile(B, batch_tile)
    out_rows = B if full else tb * grid                # output blocks are never ragged

    kernel = functools.partial(actor_kernel, h1=packed["h1"], h2=packed["h2"],
                               act_dim=act_dim, head_pad=packed["head_pad"])

    out = pl.pallas_call(
        kernel,
        out_shape=jax.ShapeDtypeStruct((out_rows, OUT_PAD), out_dtype),
        grid_spec=pltpu.PrefetchScalarGridSpec(
            num_scalar_prefetch=0,
            grid=(grid,),
            in_specs=[
                pl.BlockSpec((tb, obs_dim), lambda i: (i, 0)),   # obs: batch-tiled
                pl.BlockSpec((tb, act_dim), lambda i: (i, 0)),   # eps: batch-tiled
                pl.BlockSpec(w1.shape, lambda i: (0, 0)),        # weights: VMEM-resident
                pl.BlockSpec(w2.shape, lambda i: (0, 0)),
                pl.BlockSpec(wh.shape, lambda i: (0, 0)),
                pl.BlockSpec(vecs.shape, lambda i: (0, 0)),
            ],
            out_specs=pl.BlockSpec((tb, OUT_PAD), lambda i: (i, 0)),
        ),
        compiler_params=pltpu.CompilerParams(
            dimension_semantics=("parallel",)),
    )(obs, eps, w1, w2, wh, vecs)

    pi_action = out[:B, :act_dim]
    logp_pi = out[:B, act_dim]   # PyTorch: .sum(1, keepdim=True).squeeze(-1) -> (B,)
    return pi_action, logp_pi


# ---------------------------------------------------------------------------
# Demo / self-test
# ---------------------------------------------------------------------------
def _kaiming_uniform(key, fan_in, fan_out):
    # kaiming_uniform_ with nonlinearity='relu': bound = sqrt(6 / fan_in); stored (in, out).
    bound = math.sqrt(6.0 / fan_in)
    return jax.random.uniform(key, (fan_in, fan_out), jnp.float32, -bound, bound)


def _small_uniform(key, fan_in, fan_out):
    # uniform(-0.003, 0.003) for the output heads
    return jax.random.uniform(key, (fan_in, fan_out), jnp.float32, -0.003, 0.003)


def _reference(obs, eps, params, act_scale, act_bias):
    w1, b1, w2, b2, wmu, bmu, wls, bls = params
    h = jnp.maximum(obs @ w1 + b1, 0.0)
    h = jnp.maximum(h @ w2 + b2, 0.0)
    mu = h @ wmu + bmu
    ls = jnp.tanh(h @ wls + bls)
    ls = LOG_STD_MIN + 0.5 * (LOG_STD_MAX - LOG_STD_MIN) * (ls + 1.0)
    std = jnp.exp(ls)
    x_t = mu + std * eps
    y_t = jnp.tanh(x_t)
    pi = y_t * act_scale + act_bias
    lp = -0.5 * jnp.square((x_t - mu) / std) - ls - 0.5 * math.log(2.0 * math.pi)
    lp = lp - jnp.log(act_scale * (1.0 - jnp.square(y_t)) + 1e-6)
    return pi, jnp.sum(lp, axis=1)


if __name__ == "__main__":
    B, obs_dim, act_dim = 8, 16, 4
    hidden_sizes = (32, 32)

    key = jax.random.PRNGKey(0)
    k_obs, k_eps, k1, k2, kmu, kls, k_obs2, k_eps2 = jax.random.split(key, 8)

    obs = jax.random.normal(k_obs, (B, obs_dim), jnp.float32)
    eps = jax.random.normal(k_eps, (B, act_dim), jnp.float32)   # rsample noise

    w1 = _kaiming_uniform(k1, obs_dim, hidden_sizes[0])
    b1 = jnp.zeros((1, hidden_sizes[0]), jnp.float32)
    w2 = _kaiming_uniform(k2, hidden_sizes[0], hidden_sizes[1])
    b2 = jnp.zeros((1, hidden_sizes[1]), jnp.float32)
    wmu = _small_uniform(kmu, hidden_sizes[1], act_dim)
    bmu = jnp.zeros((1, act_dim), jnp.float32)
    wls = _small_uniform(kls, hidden_sizes[1], act_dim)
    bls = jnp.zeros((1, act_dim), jnp.float32)
    params = (w1, b1, w2, b2, wmu, bmu, wls, bls)

    act_scale = jnp.full((1, act_dim), 1.5, jnp.float32)
    act_bias = jnp.full((1, act_dim), 0.1, jnp.float32)

    packed = pack_actor_params(params, act_scale, act_bias)   # cached once per param update

    # 1) f32 output path: tight check of the kernel algebra.
    pi32, lp32 = squashed_gaussian_actor(obs, eps, packed, out_dtype=jnp.float32)
    jax.block_until_ready((pi32, lp32))
    pi_ref, lp_ref = _reference(obs, eps, params, act_scale, act_bias)
    assert pi32.shape == (B, act_dim) and lp32.shape == (B,)
    assert jnp.allclose(pi32, pi_ref, atol=1e-4), "pi_action mismatch (f32)"
    assert jnp.allclose(lp32, lp_ref, atol=1e-4), "logp_pi mismatch (f32)"

    # 2) default bf16 output slab (halved HBM write traffic): looser tolerance.
    pi_bf, lp_bf = squashed_gaussian_actor(obs, eps, packed)
    jax.block_until_ready((pi_bf, lp_bf))
    assert jnp.allclose(pi_bf.astype(jnp.float32), pi_ref, atol=2e-2), "pi_action mismatch (bf16)"
    assert jnp.allclose(lp_bf.astype(jnp.float32), lp_ref, atol=2e-1), "logp_pi mismatch (bf16)"

    # 3) multi-step grid with a ragged last input block (no wrapper-side padding).
    B2 = 20
    obs2 = jax.random.normal(k_obs2, (B2, obs_dim), jnp.float32)
    eps2 = jax.random.normal(k_eps2, (B2, act_dim), jnp.float32)
    pi2, lp2 = squashed_gaussian_actor(obs2, eps2, packed, batch_tile=8,
                                       out_dtype=jnp.float32)
    jax.block_until_ready((pi2, lp2))
    pi2_ref, lp2_ref = _reference(obs2, eps2, params, act_scale, act_bias)
    assert jnp.allclose(pi2, pi2_ref, atol=1e-4), "pi_action mismatch (ragged)"
    assert jnp.allclose(lp2, lp2_ref, atol=1e-4), "logp_pi mismatch (ragged)"

    print("KERNEL_OK")
</pallas_src>

<mosaic_0001>
module attributes {stable_mosaic.version = 11 : i64} {
  func.func @actor_kernel(%arg0: i32, %arg1: memref<8x16xf32, #tpu.memory_space<vmem>>, %arg2: memref<8x4xf32, #tpu.memory_space<vmem>>, %arg3: memref<16x32xf32, #tpu.memory_space<vmem>>, %arg4: memref<32x32xf32, #tpu.memory_space<vmem>>, %arg5: memref<32x256xf32, #tpu.memory_space<vmem>>, %arg6: memref<8x256xf32, #tpu.memory_space<vmem>>, %arg7: memref<8x128xf32, #tpu.memory_space<vmem>>) attributes {dimension_semantics = [#tpu.dimension_semantics<parallel>], iteration_bounds = array<i64: 1>, scalar_prefetch = 0 : i64, scratch_operands = 0 : i64, tpu.core_type = #tpu.core_type<tc>, window_params = [{transform_indices = @transform_0, window_bounds = array<i64: 8, 16>}, {transform_indices = @transform_1, window_bounds = array<i64: 8, 4>}, {pipeline_mode = #tpu.pipeline_mode<synchronous>, transform_indices = @transform_2, window_bounds = array<i64: 16, 32>}, {pipeline_mode = #tpu.pipeline_mode<synchronous>, transform_indices = @transform_3, window_bounds = array<i64: 32, 32>}, {pipeline_mode = #tpu.pipeline_mode<synchronous>, transform_indices = @transform_4, window_bounds = array<i64: 32, 256>}, {pipeline_mode = #tpu.pipeline_mode<synchronous>, transform_indices = @transform_5, window_bounds = array<i64: 8, 256>}, {transform_indices = @transform_6, window_bounds = array<i64: 8, 128>}]} {
    %c0 = arith.constant 0 : index
    %c0_0 = arith.constant 0 : index
    %0 = vector.load %arg1[%c0, %c0_0] : memref<8x16xf32, #tpu.memory_space<vmem>>, vector<8x16xf32>
    %c0_1 = arith.constant 0 : index
    %c0_2 = arith.constant 0 : index
    %1 = vector.load %arg2[%c0_1, %c0_2] : memref<8x4xf32, #tpu.memory_space<vmem>>, vector<8x4xf32>
    %c0_3 = arith.constant 0 : index
    %c0_4 = arith.constant 0 : index
    %2 = vector.load %arg6[%c0_3, %c0_4] : memref<8x256xf32, #tpu.memory_space<vmem>>, vector<1x32xf32>
    %c1 = arith.constant 1 : index
    %c0_5 = arith.constant 0 : index
    %3 = vector.load %arg6[%c1, %c0_5] : memref<8x256xf32, #tpu.memory_space<vmem>>, vector<1x32xf32>
    %c2 = arith.constant 2 : index
    %c0_6 = arith.constant 0 : index
    %4 = vector.load %arg6[%c2, %c0_6] : memref<8x256xf32, #tpu.memory_space<vmem>>, vector<1x256xf32>
    %c3 = arith.constant 3 : index
    %c0_7 = arith.constant 0 : index
    %5 = vector.load %arg6[%c3, %c0_7] : memref<8x256xf32, #tpu.memory_space<vmem>>, vector<1x4xf32>
    %c4 = arith.constant 4 : index
    %c0_8 = arith.constant 0 : index
    %6 = vector.load %arg6[%c4, %c0_8] : memref<8x256xf32, #tpu.memory_space<vmem>>, vector<1x4xf32>
    %c0_9 = arith.constant 0 : index
    %c0_10 = arith.constant 0 : index
    %7 = vector.load %arg3[%c0_9, %c0_10] : memref<16x32xf32, #tpu.memory_space<vmem>>, vector<16x32xf32>
    %cst = arith.constant dense<0.000000e+00> : vector<8x32xf32>
    %8 = tpu.matmul %0, %7, %cst {dimension_numbers = #tpu.dot_dimension_numbers<[1], [0], [0], [1], [0, 0, 1, 1], [], []>} : vector<8x16xf32>, vector<16x32xf32>, vector<8x32xf32> -> vector<8x32xf32>
    %9 = vector.broadcast %2 : vector<1x32xf32> to vector<8x32xf32>
    %10 = arith.addf %8, %9 : vector<8x32xf32>
    %cst_11 = arith.constant 0.000000e+00 : f32
    %11 = vector.broadcast %cst_11 : f32 to vector<8x32xf32>
    %12 = arith.maximumf %10, %11 : vector<8x32xf32>
    %c0_12 = arith.constant 0 : index
    %c0_13 = arith.constant 0 : index
    %13 = vector.load %arg4[%c0_12, %c0_13] : memref<32x32xf32, #tpu.memory_space<vmem>>, vector<32x32xf32>
    %cst_14 = arith.constant dense<0.000000e+00> : vector<8x32xf32>
    %14 = tpu.matmul %12, %13, %cst_14 {dimension_numbers = #tpu.dot_dimension_numbers<[1], [0], [0], [1], [0, 0, 1, 1], [], []>} : vector<8x32xf32>, vector<32x32xf32>, vector<8x32xf32> -> vector<8x32xf32>
    %15 = vector.broadcast %3 : vector<1x32xf32> to vector<8x32xf32>
    %16 = arith.addf %14, %15 : vector<8x32xf32>
    %cst_15 = arith.constant 0.000000e+00 : f32
    %17 = vector.broadcast %cst_15 : f32 to vector<8x32xf32>
    %18 = arith.maximumf %16, %17 : vector<8x32xf32>
    %c0_16 = arith.constant 0 : index
    %c0_17 = arith.constant 0 : index
    %19 = vector.load %arg5[%c0_16, %c0_17] : memref<32x256xf32, #tpu.memory_space<vmem>>, vector<32x256xf32>
    %cst_18 = arith.constant dense<0.000000e+00> : vector<8x256xf32>
    %20 = tpu.matmul %18, %19, %cst_18 {dimension_numbers = #tpu.dot_dimension_numbers<[1], [0], [0], [1], [0, 0, 1, 1], [], []>} : vector<8x32xf32>, vector<32x256xf32>, vector<8x256xf32> -> vector<8x256xf32>
    %21 = vector.broadcast %4 : vector<1x256xf32> to vector<8x256xf32>
    %22 = arith.addf %20, %21 : vector<8x256xf32>
    %23 = vector.extract_strided_slice %22 {offsets = [0, 0], sizes = [8, 128], strides = [1, 1]} : vector<8x256xf32> to vector<8x128xf32>
    %24 = vector.extract_strided_slice %22 {offsets = [0, 128], sizes = [8, 128], strides = [1, 1]} : vector<8x256xf32> to vector<8x128xf32>
    %25 = math.tanh %24 : vector<8x128xf32>
    %cst_19 = arith.constant 1.000000e+00 : f32
    %26 = vector.broadcast %cst_19 : f32 to vector<8x128xf32>
    %27 = arith.addf %25, %26 : vector<8x128xf32>
    %cst_20 = arith.constant 3.500000e+00 : f32
    %28 = vector.broadcast %cst_20 : f32 to vector<8x128xf32>
    %29 = arith.mulf %28, %27 : vector<8x128xf32>
    %cst_21 = arith.constant -5.000000e+00 : f32
    %30 = vector.broadcast %cst_21 : f32 to vector<8x128xf32>
    %31 = arith.addf %30, %29 : vector<8x128xf32>
    %32 = math.exp %31 : vector<8x128xf32>
    %33 = vector.extract_strided_slice %23 {offsets = [0, 0], sizes = [8, 4], strides = [1, 1]} : vector<8x128xf32> to vector<8x4xf32>
    %34 = vector.extract_strided_slice %32 {offsets = [0, 0], sizes = [8, 4], strides = [1, 1]} : vector<8x128xf32> to vector<8x4xf32>
    %35 = arith.mulf %34, %1 : vector<8x4xf32>
    %36 = arith.addf %33, %35 : vector<8x4xf32>
    %37 = math.tanh %36 : vector<8x4xf32>
    %38 = vector.broadcast %5 : vector<1x4xf32> to vector<8x4xf32>
    %39 = arith.mulf %37, %38 : vector<8x4xf32>
    %40 = vector.broadcast %6 : vector<1x4xf32> to vector<8x4xf32>
    %41 = arith.addf %39, %40 : vector<8x4xf32>
    %42 = arith.mulf %1, %1 : vector<8x4xf32>
    %cst_22 = arith.constant -5.000000e-01 : f32
    %43 = vector.broadcast %cst_22 : f32 to vector<8x4xf32>
    %44 = arith.mulf %43, %42 : vector<8x4xf32>
    %45 = vector.extract_strided_slice %31 {offsets = [0, 0], sizes = [8, 4], strides = [1, 1]} : vector<8x128xf32> to vector<8x4xf32>
    %46 = arith.subf %44, %45 : vector<8x4xf32>
    %cst_23 = arith.constant 0.918938517 : f32
    %47 = vector.broadcast %cst_23 : f32 to vector<8x4xf32>
    %48 = arith.subf %46, %47 : vector<8x4xf32>
    %49 = arith.mulf %37, %37 : vector<8x4xf32>
    %cst_24 = arith.constant 1.000000e+00 : f32
    %50 = vector.broadcast %cst_24 : f32 to vector<8x4xf32>
    %51 = arith.subf %50, %49 : vector<8x4xf32>
    %52 = vector.broadcast %5 : vector<1x4xf32> to vector<8x4xf32>
    %53 = arith.mulf %52, %51 : vector<8x4xf32>
    %cst_25 = arith.constant 9.99999997E-7 : f32
    %54 = vector.broadcast %cst_25 : f32 to vector<8x4xf32>
    %55 = arith.addf %53, %54 : vector<8x4xf32>
    %56 = math.log %55 : vector<8x4xf32>
    %57 = arith.subf %48, %56 : vector<8x4xf32>
    %cst_26 = arith.constant dense<0.000000e+00> : vector<8xf32>
    %58 = vector.multi_reduction <add>, %57, %cst_26 [1] : vector<8x4xf32> to vector<8xf32>
    %59 = vector.shape_cast %58 : vector<8xf32> to vector<8x1xf32>
    %60 = tpu.iota {dimensions = array<i32: 1>} : vector<8x128xi32>
    %c4_i32 = arith.constant 4 : i32
    %61 = vector.broadcast %c4_i32 : i32 to vector<8x128xi32>
    %62 = arith.cmpi eq, %60, %61 : vector<8x128xi32>
    %cst_27 = arith.constant 0.000000e+00 : f32
    %63 = vector.shape_cast %59 : vector<8x1xf32> to vector<8x1xf32>
    %64 = vector.broadcast %63 : vector<8x1xf32> to vector<8x128xf32>
    %65 = vector.broadcast %cst_27 : f32 to vector<8x128xf32>
    %66 = arith.select %62, %64, %65 : vector<8x128xi1>, vector<8x128xf32>
    %c0_28 = arith.constant 0 : index
    %c0_29 = arith.constant 0 : index
    %67 = vector.load %arg7[%c0_28, %c0_29] : memref<8x128xf32, #tpu.memory_space<vmem>>, vector<8x128xf32>
    tpu.vector_store %arg7[%c0_28, %c0_29], %66 {strides = array<i32>} : memref<8x128xf32, #tpu.memory_space<vmem>>, vector<8x128xf32>,
    %c0_30 = arith.constant 0 : index
    %c0_31 = arith.constant 0 : index
    %68 = vector.load %arg7[%c0_30, %c0_31] : memref<8x128xf32, #tpu.memory_space<vmem>>, vector<8x4xf32>
    tpu.vector_store %arg7[%c0_30, %c0_31], %41 {strides = array<i32>} : memref<8x128xf32, #tpu.memory_space<vmem>>, vector<8x4xf32>,
    return
  }
  func.func @transform_0(%arg0: i32) -> (i32, i32) {
    %c0_i32 = arith.constant 0 : i32
    %c0_i32_0 = arith.constant 0 : i32
    return %arg0, %c0_i32 : i32, i32
  }
  func.func @transform_1(%arg0: i32) -> (i32, i32) {
    %c0_i32 = arith.constant 0 : i32
    %c0_i32_0 = arith.constant 0 : i32
    return %arg0, %c0_i32 : i32, i32
  }
  func.func @transform_2(%arg0: i32) -> (i32, i32) {
    %c0_i32 = arith.constant 0 : i32
    %c0_i32_0 = arith.constant 0 : i32
    %c0_i32_1 = arith.constant 0 : i32
    return %c0_i32, %c0_i32_0 : i32, i32
  }
  func.func @transform_3(%arg0: i32) -> (i32, i32) {
    %c0_i32 = arith.constant 0 : i32
    %c0_i32_0 = arith.constant 0 : i32
    %c0_i32_1 = arith.constant 0 : i32
    return %c0_i32, %c0_i32_0 : i32, i32
  }
  func.func @transform_4(%arg0: i32) -> (i32, i32) {
    %c0_i32 = arith.constant 0 : i32
    %c0_i32_0 = arith.constant 0 : i32
    %c0_i32_1 = arith.constant 0 : i32
    return %c0_i32, %c0_i32_0 : i32, i32
  }
  func.func @transform_5(%arg0: i32) -> (i32, i32) {
    %c0_i32 = arith.constant 0 : i32
    %c0_i32_0 = arith.constant 0 : i32
    %c0_i32_1 = arith.constant 0 : i32
    return %c0_i32, %c0_i32_0 : i32, i32
  }
  func.func @transform_6(%arg0: i32) -> (i32, i32) {
    %c0_i32 = arith.constant 0 : i32
    %c0_i32_0 = arith.constant 0 : i32
    return %arg0, %c0_i32 : i32, i32
  }
}

</mosaic_0001>

<bundles_post_ra>
// kernel: tpu_custom_call.1
= control target key start
LH: loop header
LB: loop body
LE: loop exit
PB: predicated region body
PF: predicated region fallthrough
CT: control target
= control target key end

     0   :  { %11 = vsyncpa [#allocation3], 0  ;;  %s622_s0 = inlined_call_operand.hbm [shape: f32[8,16], index: 0, kind: input, shape index: {}]   ;;  %s623_s1 = inlined_call_operand.vmem [shape: f32[8,4], index: 1, kind: input, shape index: {}]   ;;  %s624_s2 = inlined_call_operand.hbm [shape: f32[16,32], index: 2, kind: input, shape index: {}]   ;;  %s625_s3 = inlined_call_operand.hbm [shape: f32[32,32], index: 3, kind: input, shape index: {}]   ;;  %s626_s4 = inlined_call_operand.hbm [shape: f32[32,256], index: 4, kind: input, shape index: {}]   ;;  %s627_s5 = inlined_call_operand.vmem [shape: f32[8,256], index: 5, kind: input, shape index: {}]   ;;  %s628_s6 = inlined_call_operand.hbm [shape: f32[8,128], index: 6, kind: output, shape index: {}]  }
   0x1   :  { %12 = vsyncpa [#allocation6], 0 }
   0x2   :  { %13 = vsyncpa [#allocation9], 0 }
   0x3   :  { %14 = vsyncpa [#allocation4], 0  ;;  %s541_s21 = smov [#allocation5]  }
   0x4   :  { %s32_s22 = sshll.u32 %s541_s21, 4  ;;  %s33_s22 = int_to_ptr.vmem [resolvable:$true] %s32_s22 }
   0x5   :  { %s441_s23 = scalar_lea.vmem %s33_s22, 256  ;;  %p446_p1 = scmp.lt.s32.totalorder %s33_s22, %s33_s22 }
   0x6   :  { %p442_p0 = scmp.ne.s32.totalorder %s33_s22, %s441_s23  ;;  %p447_p2 = scmp.lt.s32.totalorder %s441_s23, %s441_s23 }
   0x8   :  { %p448_p3 = por %p447_p2, %p446_p1 }
   0xa   :  { %p449_p4 = pnand %p448_p3, %p442_p0 }
   0xc   :  { %452 = shalt.err (!%p449_p4)
}
   0xd   :  { %s542_s24 = smov 128   ;;  %s543_s25 = smov 8  }
   0xe   :  { %38 = dma.hbm_to_vmem [thread:$0]  %s624_s2, 256, %s33_s22, [#allocation6], %s542_s24, %s542_s24, %s543_s25  }
   0xf   :  { %s544_s28 = smov [#allocation2]   ;;  %s545_s30 = smov [#allocation7]  }
  0x10   :  { %s21_s29 = sshll.u32 %s544_s28, 4  ;;  %s44_s7 = sshll.u32 %s545_s30, 4  ;;  %s22_s29 = int_to_ptr.vmem [resolvable:$true] %s21_s29  ;;  %s45_s7 = int_to_ptr.vmem [resolvable:$true] %s44_s7 }
  0x11   :  { %s461_s8 = scalar_lea.vmem %s22_s29, 128  ;;  %p466_p6 = scmp.lt.s32.totalorder %s22_s29, %s22_s29 }
  0x12   :  { %p462_p5 = scmp.ne.s32.totalorder %s22_s29, %s461_s8  ;;  %p467_p7 = scmp.lt.s32.totalorder %s461_s8, %s461_s8 }
  0x14   :  { %p468_p8 = por %p467_p7, %p466_p6 }
  0x16   :  { %p469_p9 = pnand %p468_p8, %p462_p5 }
  0x18   :  { %472 = shalt.err (!%p469_p9)
}
  0x19   :  { %24 = dma.hbm_to_vmem [thread:$0]  %s622_s0, 128, %s22_s29, [#allocation3]  }
  0x1a   :  { %s481_s11 = scalar_lea.vmem %s45_s7, 512  ;;  %p486_p11 = scmp.lt.s32.totalorder %s45_s7, %s45_s7 }
  0x1b   :  { %p482_p10 = scmp.ne.s32.totalorder %s45_s7, %s481_s11  ;;  %p487_p12 = scmp.lt.s32.totalorder %s481_s11, %s481_s11 }
  0x1d   :  { %p488_p13 = por %p487_p12, %p486_p11 }
  0x1f   :  { %p489_p0 = pnand %p488_p13, %p482_p10 }
  0x21   :  { %492 = shalt.err (!%p489_p0)
}
  0x22   :  { %50 = dma.hbm_to_vmem [thread:$0]  %s625_s3, 512, %s45_s7, [#allocation6], %s542_s24, %s542_s24, %s543_s25  }
  0x23   :  { %s546_s13 = smov [#allocation8]  }
  0x24   :  { %s56_s14 = sshll.u32 %s546_s13, 4  ;;  %s57_s14 = int_to_ptr.vmem [resolvable:$true] %s56_s14 }
  0x25   :  { %s501_s15 = scalar_lea.vmem %s57_s14, 1024  ;;  %p506_p2 = scmp.lt.s32.totalorder %s57_s14, %s57_s14 }
  0x26   :  { %p502_p1 = scmp.ne.s32.totalorder %s57_s14, %s501_s15  ;;  %p507_p3 = scmp.lt.s32.totalorder %s501_s15, %s501_s15 }
  0x28   :  { %p508_p4 = por %p507_p3, %p506_p2 }
  0x2a   :  { %p509_p5 = pnand %p508_p4, %p502_p1 }
  0x2c   :  { %512 = shalt.err (!%p509_p5)
}
  0x2d   :  { %s547_s0 = smov 256   ;;  %s548_s16 = smov 16  }
  0x2e   :  { %62 = dma.hbm_to_vmem [thread:$0]  %s626_s4, 1024, %s57_s14, [#allocation9], %s547_s0, %s547_s0, %s548_s16  }
  0x2f   :  { %533 = dma.done.wait [#allocation3], 128  }
  0x30   :  { %534 = vsyncadd [#allocation3], 4294967168 }
  0x31   :  { %535 = dma.done.wait [#allocation6], 768  }
  0x32   :  { %536 = vsyncadd [#allocation6], 4294966528 }
  0x33   :  { %537 = dma.done.wait [#allocation9], 1024  }
  0x34   :  { %538 = vsyncadd [#allocation9], 4294966272  ;;  %v549_v0 = vmov 0.0   ;;  %vm550_vm0 = vmmov 0   ;;  %v86_v1 = vld [vmem:[#allocation5 + $0x8] sm:$0xff]  ;;  %v85_v2 = vld [vmem:[#allocation5] sm:$0xff]  ;;  %v250_v26 = vlaneseq }
  0x35   :  { %396 = vmatprep.subr.mxu0 %v549_v0  ;;  %400 = vmatprep.mubr.msk.f32.mxu0 %vm550_vm0, %v549_v0  ;;  %v77_v3 = vld [vmem:[#allocation2] sm:$0xff]  ;;  %vm87_vm1 = vcmask 130048   ;;  %v165_v4 = vld [vmem:[#allocation7 + $0x18] sm:$0xff]  ;;  %v164_v5 = vld [vmem:[#allocation7 + $0x10] sm:$0xff]  ;;  %vm166_vm2 = vcmask 261120   ;;  %vm356_vm3 = vcmask 31744  }
  0x36   :  { %403 = vmatprep.subr.mxu1 %v549_v0  ;;  %411 = vmatprep.mubr.msk.f32.mxu1 %vm550_vm0, %v549_v0  ;;  %v163_v6 = vld [vmem:[#allocation7 + $0x8] sm:$0xff]  ;;  %v162_v7 = vld [vmem:[#allocation7] sm:$0xff]  ;;  %v248_v8 = vld [vmem:[#allocation8 + $0x38] sm:$0xff]  ;;  %v251_v27 = vshrl.u32 %v250_v26, 7  ;;  %v361_v61 = vand.u32 127, %v250_v26  ;;  %s551_s28 = smov [#allocation10]  }
  0x37   :  { %397 = vmatpush3.msra.mxu0 %v86_v1  ;;  %404 = vmatpush3.msra.mxu1 %v165_v4  ;;  %v247_v9 = vld [vmem:[#allocation8 + $0x30] sm:$0xff]  ;;  %v246_v10 = vld [vmem:[#allocation8 + $0x28] sm:$0xff]  ;;  %v245_v16 = vld [vmem:[#allocation8 + $0x20] sm:$0xff]  ;;  %s372_s29 = sshll.u32 %s551_s28, 4  ;;  %s373_s29 = int_to_ptr.vmem [resolvable:$true] %s372_s29 }
  0x38   :  { %398 = vmatprep.subr.mxu0 %v549_v0  ;;  %405 = vmatprep.subr.mxu1 %v549_v0  ;;  %v79_v11 = vld [vmem:[%s627_s5] ss:$0 sm:$0xff]  ;;  %v244_v17 = vld [vmem:[#allocation8 + $0x18] sm:$0xff]  ;;  %v243_v18 = vld [vmem:[#allocation8 + $0x10] sm:$0xff]  ;;  %v256_v28 = vsub.s32 1, %v251_v27  ;;  %v252_v39 = vsub.s32 0, %v251_v27  ;;  %p518_p7 = scmp.lt.s32.totalorder %s373_s29, %s373_s29 }
  0x39   :  { %399 = vmatpush3.msra.mxu0 %v85_v2  ;;  %406 = vmatpush3.msra.mxu1 %v164_v5  ;;  %v242_v19 = vld [vmem:[#allocation8 + $0x8] sm:$0xff]  ;;  %v241_v20 = vld [vmem:[#allocation8] sm:$0xff]  ;;  %vm362_vm4 = vcmp.eq.s32.totalorder %v361_v61, 4  ;;  %s513_s30 = scalar_lea.vmem %s373_s29, 128 }
  0x3a   :  { %401 = vmatmul.mubr.msk.f32.vlgmr.msra.gmra.mxu0 %vm87_vm1, %v77_v3  ;;  %407 = vmatprep.subr.mxu1 %v549_v0  ;;  %v80_v21 = vld [vmem:[%s627_s5 + $0x1] ss:$0 sm:$0xff]  ;;  %v383_v29 = vld [vmem:[%s627_s5 + $0x2] ss:$8 sm:$0x3]  ;;  %p514_p6 = scmp.ne.s32.totalorder %s373_s29, %s513_s30  ;;  %p519_p8 = scmp.lt.s32.totalorder %s513_s30, %s513_s30 }
  0x3b   :  { %327 = vmatprep.mubr.f32.mxu0 %v549_v0  ;;  %408 = vmatpush3.msra.mxu1 %v163_v6  ;;  %v257_v30 = vrot.slane %v383_v29, %v256_v28  ;;  %v253_v40 = vrot.slane %v383_v29, %v252_v39  ;;  %v78_v42 = vld [vmem:[%s623_s1] sm:$0xff] }
  0x3c   :  { %409 = vmatprep.subr.mxu1 %v549_v0  ;;  %287 = vmatprep.subr.mxu0 %v248_v8  ;;  %v83_v46 = vld [vmem:[%s627_s5 + $0x3] ss:$0 sm:$0xff]  ;;  %v345_v53 = vmul.f32 %v78_v42, %v78_v42  ;;  %v84_v62 = vld [vmem:[%s627_s5 + $0x4] ss:$0 sm:$0xff]  ;;  %p520_p9 = por %p519_p8, %p518_p7 }
  0x3d   :  { %410 = vmatpush3.msra.mxu1 %v162_v7  ;;  %288 = vmatpush1.msra.mxu0 %v247_v9 }
  0x3e   :  { %289 = vmatprep.subr.mxu0 %v246_v10  ;;  %v346_v54 = vmul.f32 -0.5, %v345_v53  ;;  %p521_p10 = pnand %p520_p9, %p514_p6 }
  0x3f   :  { %290 = vmatpush1.msra.mxu0 %v245_v16 }
  0x40   :  { %291 = vmatprep.subr.mxu0 %v244_v17 }
  0x41   :  { %292 = vmatpush1.msra.mxu0 %v243_v18 }
  0x42   :  { %293 = vmatprep.subr.mxu0 %v242_v19 }
  0x43   :  { %294 = vmatpush1.msra.mxu0 %v241_v20 }
  0xfa   :  { %v157_v12 = vpop.f32.mrf.mxu0 }
  0xfb   :  { %v158_v13 = vadd.f32 %v157_v12, %v79_v11 }
  0xfc   :  { %v402_v14 = vpop.f32.mrf.mxu0 }
  0xfd   :  { %v161_v15 = vmax.f32 %v158_v13, 0.0 }
  0xff   :  { %412 = vmatmul.mubr.msk.f32.vlgmr.msra.gmra.mxu1 %vm166_vm2, %v161_v15 }
 0x1bf   :  { %v236_v22 = vpop.f32.mrf.mxu1 }
 0x1c0   :  { %v237_v23 = vadd.f32 %v236_v22, %v80_v21 }
 0x1c1   :  { %v413_v24 = vpop.f32.mrf.mxu1 }
 0x1c2   :  { %v240_v25 = vmax.f32 %v237_v23, 0.0 }
 0x1c4   :  { %386 = vmatmul.mubr.msk.f32.vlgmr.msra.gmra.mxu0 %vm166_vm2, %v240_v25 }
 0x284   :  { %v329_v31 = vpop.f32.mrf.mxu0 }
 0x285   :  { %v330_v43 = vadd.f32 %v329_v31, %v253_v40 }
 0x286   :  { %v331_v32 = vpop.f32.mrf.mxu0 }
 0x287   :  { %v332_v33 = vadd.f32 %v331_v32, %v257_v30 }
 0x289   :  { %425 = vtanh.f32 %v332_v33 }
 0x296   :  { %v426_v34 = vpop.eup %425 }
 0x297   :  { %v335_v35 = vadd.f32 1.0, %v426_v34 }
 0x299   :  { %v336_v36 = vmul.f32 3.5, %v335_v35 }
 0x29b   :  { %v337_v37 = vadd.f32 -5.0, %v336_v36 }
 0x29d   :  { %v338_v38 = vmul.f32 1.442695, %v337_v37  ;;  %v347_v55 = vsub.f32 %v346_v54, %v337_v37 }
 0x29f   :  { %427 = vpow2.f32 %v338_v38  ;;  %v387_v57 = vadd.f32 -0.9189385, %v347_v55 }
 0x2ac   :  { %v428_v41 = vpop.eup %427 }
 0x2ad   :  { %v340_v44 = vmul.f32 %v428_v41, %v78_v42 }
 0x2af   :  { %v341_v45 = vadd.f32 %v340_v44, %v330_v43 }
 0x2b1   :  { %429 = vtanh.f32 %v341_v45 }
 0x2be   :  { %v430_v47 = vpop.eup %429 }
 0x2bf   :  { %v343_v48 = vmul.f32 %v430_v47, %v83_v46  ;;  %v349_v49 = vmul.f32 %v430_v47, %v430_v47 }
 0x2c1   :  { %v350_v50 = vsub.f32 1.0, %v349_v49  ;;  %v344_v1 = vadd.f32 %v343_v48, %v84_v62 }
 0x2c3   :  { %v351_v51 = vmul.f32 %v350_v50, %v83_v46 }
 0x2c5   :  { %v352_v52 = vadd.f32 1e-06, %v351_v51 }
 0x2c7   :  { %431 = vlog2.f32 %v352_v52 }
 0x2d4   :  { %v432_v56 = vpop.eup %431 }
 0x2d5   :  { %v354_v58 = vmul.f32 0.6931472, %v432_v56 }
 0x2d7   :  { %v355_v59 = vsub.f32 %v387_v57, %v354_v58 }
 0x2d9   :  { %v357_v60 = vsel %vm356_vm3, %v355_v59, 0.0 }
 0x2da   :  { %358 = vadd.xlane.f32.xlu0 %v357_v60 }
 0x363   :  { %v359_v63 = vpop.xlane.xlu0 %358 }
 0x364   :  { %v363_v0 = vsel %vm362_vm4, %v359_v63, 0.0 }
 0x365   :  { %364 = vst [vmem:[#allocation10] sm:$0xff] %v363_v0 }
 0x366   :  { %365 = vst.msk [vmem:[#allocation10] sm:$0xff] %vm356_vm3, %v344_v1 }
 0x367   :  { %524 = shalt.err (!%p521_p10)
}
 0x368   :  { %375 = dma.vmem_to_hbm [thread:$0]  %s373_s29, 128, %s628_s6, [#allocation4]  }
 0x369   :  { %539 = dma.done.wait [#allocation4], 128  }
 0x36a   :  { %540 = vsyncadd [#allocation4], 4294967168 }
 0x36b   :  { %379 = vsyncpa [#allocation3], 1 }
 0x36c   :  { %380 = vsyncpa [#allocation6], 1 }
 0x36d   :  { %381 = vsyncpa [#allocation9], 1 }
 0x36e   :  { %382 = vsyncpa [#allocation4], 1 }

</bundles_post_ra>
